<compile_context>
chip_gen: v7x
topology: tpu7x:2x2x1
jax: 0.10.0
libtpu: 0.0.40
codegen_flags: <defaults>
</compile_context>

<pallas_src>
import math

import numpy as np
import jax
import jax.numpy as jnp
from jax.experimental import pallas as pl
from jax.experimental.pallas import tpu as pltpu

# ---------------- configuration ----------------
SEQ_LEN = 32
PRED_LEN = 16
ENC_IN = 4
NFFT = 8
HOP = 4
N_FREQS = NFFT // 2 + 1                 # 5
LAT_IN = 1 + SEQ_LEN // HOP             # 9  (latent_input_len)
LAT_PRED = 1 + PRED_LEN // HOP          # 5  (latent_pred_len)
PAD = NFFT // 2

IN_FEAT = SEQ_LEN * ENC_IN              # 128  (flattened input row)
OUT_FEAT = PRED_LEN * ENC_IN            # 64   (flattened output row)
PAIR_IN = 2 * IN_FEAT                   # 256  -> exactly fills v6e/v7x MXU K
PAIR_OUT = 2 * OUT_FEAT                 # 128  -> lane-dense (unmasked) stores
TB_MAX = 1024                           # paired rows per batch tile
                                        # (in 1 MiB + out 0.5 MiB per block,
                                        #  double-buffered << v7x 64 MiB VMEM)


# ---------------- STFT constants (numpy, built once at import) --------------
def _hann_window_np():
    n = np.arange(NFFT, dtype=np.float64)
    return 0.5 - 0.5 * np.cos(2.0 * math.pi * n / NFFT)      # periodic Hann


def _dft_matrix_np():
    # (NFFT, 2*N_FREQS): columns [0:F] -> real part, [F:2F] -> imag part
    n = np.arange(NFFT, dtype=np.float64)[:, None]
    f = np.arange(N_FREQS, dtype=np.float64)[None, :]
    ang = 2.0 * math.pi * n * f / NFFT
    return np.concatenate([np.cos(ang), -np.sin(ang)], axis=1)


def _idft_matrix_np():
    # (2*N_FREQS, NFFT): real IDFT of a onesided spectrum
    f = np.arange(N_FREQS, dtype=np.float64)[:, None]
    n = np.arange(NFFT, dtype=np.float64)[None, :]
    ang = 2.0 * math.pi * f * n / NFFT
    coef = np.where((f == 0) | (f == NFFT // 2), 1.0, 2.0)
    re_part = coef * np.cos(ang) / NFFT
    im_part = -coef * np.sin(ang) / NFFT
    return np.concatenate([re_part, im_part], axis=0)


_WIN = _hann_window_np()
_DFT = _dft_matrix_np()
_IDFT = _idft_matrix_np()


# ---------------- per-channel affine chain (numpy reference) ----------------
def _reference_chain_np(x, w_lin, b_lin):
    """x: (N, SEQ_LEN) float64 -> (N, PRED_LEN) float64.

    Exactly the per-channel STFT -> shared Linear -> iSTFT chain of the
    PyTorch module (shared weights across channels / frequencies).
    """
    x = np.asarray(x, np.float64)
    xp = np.pad(x, ((0, 0), (PAD, PAD)), mode="reflect")               # (N, T+2P)
    idx = np.arange(LAT_IN)[:, None] * HOP + np.arange(NFFT)[None, :]  # (Lin, NFFT)
    frames = xp[:, idx] * _WIN                                         # (N, Lin, NFFT)
    spec = frames @ _DFT                                               # (N, Lin, 2F)
    real = np.transpose(spec[..., :N_FREQS], (0, 2, 1))                # (N, F, Lin)
    imag = np.transpose(spec[..., N_FREQS:], (0, 2, 1))                # (N, F, Lin)
    xf = np.stack([real, imag], axis=1)                                # (N, 2, F, Lin)
    xf_pred = xf @ w_lin.T + b_lin                                     # (N, 2, F, Lp)
    real_p = np.transpose(xf_pred[:, 0], (0, 2, 1))                    # (N, Lp, F)
    imag_p = np.transpose(xf_pred[:, 1], (0, 2, 1))
    spec_ri = np.concatenate([real_p, imag_p], axis=-1)                # (N, Lp, 2F)
    frames_rec = (spec_ri @ _IDFT) * _WIN                              # (N, Lp, NFFT)

    out_len = NFFT + HOP * (LAT_PRED - 1)
    ysum = np.zeros((x.shape[0], out_len), np.float64)
    wsq = np.zeros((out_len,), np.float64)
    for t in range(LAT_PRED):                                          # overlap-add
        ysum[:, t * HOP:t * HOP + NFFT] += frames_rec[:, t]
        wsq[t * HOP:t * HOP + NFFT] += _WIN * _WIN
    return ysum[:, PAD:PAD + PRED_LEN] / wsq[PAD:PAD + PRED_LEN]


# ---------------- fold the whole model into one affine operator -------------
def build_effective_operator(w_lin, b_lin):
    """Fold STFT -> Linear -> iSTFT (affine in x) into a single matmul.

    Returns:
      w_pair: (PAIR_IN, PAIR_OUT) = (256, 128) f32,
              kron(I2, kron(w_eff.T, I_ENC_IN)) — channel dim folded in,
              two batch rows paired for a lane-dense (128-wide) output.
      b_row : (1, PAIR_OUT) f32 effective bias for a paired row.
    """
    w_np = np.asarray(w_lin, np.float64)
    b_np = np.asarray(b_lin, np.float64)
    # probe the affine chain: zero input -> bias; identity -> columns of W
    b_eff = _reference_chain_np(np.zeros((1, SEQ_LEN)), w_np, b_np)[0]     # (P,)
    y_id = _reference_chain_np(np.eye(SEQ_LEN), w_np, b_np)                # (T, P)
    w_eff = (y_id - b_eff).T                                               # (P, T)

    # Fold channels: y_flat[p*C + c] = sum_t x_flat[t*C + c] * w_eff[p, t]
    w_kron = np.kron(w_eff.T, np.eye(ENC_IN))                              # (128, 64)
    b_flat = np.repeat(b_eff, ENC_IN)                                      # (64,)

    # Pair two batch rows -> 256-wide K (fills the MXU), 128-wide output lanes.
    w_pair = np.kron(np.eye(2), w_kron)                                    # (256, 128)
    b_row = np.concatenate([b_flat, b_flat])[None, :]                      # (1, 128)
    return jnp.asarray(w_pair, jnp.float32), jnp.asarray(b_row, jnp.float32)


# ---------------- Pallas kernel: one streaming matmul + bias ----------------
def _tflinear_kernel(x_ref, w_ref, b_ref, o_ref):
    # x_ref: (TB, 256), w_ref: (256, 128), b_ref: (1, 128), o_ref: (TB, 128)
    o_ref[...] = (
        jnp.dot(x_ref[...], w_ref[...], preferred_element_type=jnp.float32)
        + b_ref[...]
    )


def _round_up(n, m):
    return ((n + m - 1) // m) * m


@jax.jit
def model_forward(x, w_pair, b_row):
    """x: (B, SEQ_LEN, ENC_IN) f32 -> (B, PRED_LEN, ENC_IN) f32."""
    B = x.shape[0]
    n_pairs = (B + 1) // 2
    tb = min(TB_MAX, _round_up(n_pairs, 8))       # sublane-aligned tile
    n_pad = _round_up(n_pairs, tb)                # whole number of tiles
    grid = (n_pad // tb,)

    # Free reshapes of the contiguous (B, T, C) layout; zero-pad the batch so
    # every grid step sees a full (tb, 256) block (padded rows are dropped).
    x_flat = x.reshape(B, IN_FEAT)
    pad_rows = 2 * n_pad - B
    if pad_rows:
        x_flat = jnp.pad(x_flat, ((0, pad_rows), (0, 0)))
    x_pair = x_flat.reshape(n_pad, PAIR_IN)                         # (n_pad, 256)

    cost = pl.CostEstimate(
        flops=2 * n_pad * PAIR_IN * PAIR_OUT,
        transcendentals=0,
        bytes_accessed=4 * (n_pad * (PAIR_IN + PAIR_OUT)
                            + PAIR_IN * PAIR_OUT + PAIR_OUT),
    )

    y_pair = pl.pallas_call(
        _tflinear_kernel,
        out_shape=jax.ShapeDtypeStruct((n_pad, PAIR_OUT), jnp.float32),
        grid=grid,
        in_specs=[
            pl.BlockSpec((tb, PAIR_IN), lambda i: (i, 0)),          # batch tile
            pl.BlockSpec((PAIR_IN, PAIR_OUT), lambda i: (0, 0)),    # VMEM-resident W
            pl.BlockSpec((1, PAIR_OUT), lambda i: (0, 0)),          # VMEM-resident b
        ],
        out_specs=pl.BlockSpec((tb, PAIR_OUT), lambda i: (i, 0)),   # lane-dense out
        compiler_params=pltpu.CompilerParams(
            dimension_semantics=("parallel",)),    # shard batch tiles on v7x megacore
        cost_estimate=cost,
    )(x_pair, w_pair, b_row)

    y = y_pair.reshape(2 * n_pad, OUT_FEAT)[:B]
    return y.reshape(B, PRED_LEN, ENC_IN)


# ---------------- parameter init (deterministic, PyTorch-style uniform) -----
def init_params(key):
    k_w, k_b = jax.random.split(key)
    bound = 1.0 / math.sqrt(LAT_IN)
    w = jax.random.uniform(k_w, (LAT_PRED, LAT_IN), jnp.float32, -bound, bound)
    b = jax.random.uniform(k_b, (LAT_PRED,), jnp.float32, -bound, bound)
    return w, b


if __name__ == "__main__":
    key = jax.random.PRNGKey(0)
    k_x, k_p = jax.random.split(key)
    x = jax.random.normal(k_x, (2, SEQ_LEN, ENC_IN), jnp.float32)
    w_lin, b_lin = init_params(k_p)

    # One-time host-side fold of STFT/Linear/iSTFT (+ channel/pair layout).
    w_pair, b_row = build_effective_operator(w_lin, b_lin)

    out = model_forward(x, w_pair, b_row)
    out = jax.block_until_ready(out)
    assert out.shape == (2, PRED_LEN, ENC_IN), out.shape
    assert jnp.all(jnp.isfinite(out))

    # Correctness check against the unfused float64 reference chain.
    x_np = np.asarray(x, np.float64)                                   # (B, T, C)
    x_flat = np.transpose(x_np, (0, 2, 1)).reshape(-1, SEQ_LEN)        # (B*C, T)
    ref = _reference_chain_np(x_flat, np.asarray(w_lin, np.float64),
                              np.asarray(b_lin, np.float64))
    ref = ref.reshape(2, ENC_IN, PRED_LEN).transpose(0, 2, 1)          # (B, P, C)
    err = np.max(np.abs(np.asarray(out, np.float64) - ref))
    assert np.allclose(np.asarray(out, np.float64), ref, atol=2e-2, rtol=2e-2), err

    print("KERNEL_OK")
</pallas_src>

<mosaic_0001>
module attributes {stable_mosaic.version = 11 : i64} {
  func.func @_tflinear_kernel(%arg0: i32, %arg1: memref<8x256xf32, #tpu.memory_space<vmem>>, %arg2: memref<256x128xf32, #tpu.memory_space<vmem>>, %arg3: memref<1x128xf32, #tpu.memory_space<vmem>>, %arg4: memref<8x128xf32, #tpu.memory_space<vmem>>) attributes {dimension_semantics = [#tpu.dimension_semantics<parallel>], iteration_bounds = array<i64: 1>, scalar_prefetch = 0 : i64, scratch_operands = 0 : i64, tpu.core_type = #tpu.core_type<tc>, window_params = [{transform_indices = @transform_0, window_bounds = array<i64: 8, 256>}, {pipeline_mode = #tpu.pipeline_mode<synchronous>, transform_indices = @transform_1, window_bounds = array<i64: 256, 128>}, {pipeline_mode = #tpu.pipeline_mode<synchronous>, transform_indices = @transform_2, window_bounds = array<i64: 1, 128>}, {transform_indices = @transform_3, window_bounds = array<i64: 8, 128>}]} {
    %c0 = arith.constant 0 : index
    %c0_0 = arith.constant 0 : index
    %0 = vector.load %arg1[%c0, %c0_0] : memref<8x256xf32, #tpu.memory_space<vmem>>, vector<8x256xf32>
    %c0_1 = arith.constant 0 : index
    %c0_2 = arith.constant 0 : index
    %1 = vector.load %arg2[%c0_1, %c0_2] : memref<256x128xf32, #tpu.memory_space<vmem>>, vector<256x128xf32>
    %cst = arith.constant dense<0.000000e+00> : vector<8x128xf32>
    %2 = tpu.matmul %0, %1, %cst {dimension_numbers = #tpu.dot_dimension_numbers<[1], [0], [0], [1], [0, 0, 1, 1], [], []>} : vector<8x256xf32>, vector<256x128xf32>, vector<8x128xf32> -> vector<8x128xf32>
    %c0_3 = arith.constant 0 : index
    %c0_4 = arith.constant 0 : index
    %3 = vector.load %arg3[%c0_3, %c0_4] : memref<1x128xf32, #tpu.memory_space<vmem>>, vector<1x128xf32>
    %4 = vector.broadcast %3 : vector<1x128xf32> to vector<8x128xf32>
    %5 = arith.addf %2, %4 : vector<8x128xf32>
    %c0_5 = arith.constant 0 : index
    %c0_6 = arith.constant 0 : index
    %6 = vector.load %arg4[%c0_5, %c0_6] : memref<8x128xf32, #tpu.memory_space<vmem>>, vector<8x128xf32>
    tpu.vector_store %arg4[%c0_5, %c0_6], %5 {strides = array<i32>} : memref<8x128xf32, #tpu.memory_space<vmem>>, vector<8x128xf32>,
    return
  }
  func.func @transform_0(%arg0: i32) -> (i32, i32) {
    %c0_i32 = arith.constant 0 : i32
    %c0_i32_0 = arith.constant 0 : i32
    return %arg0, %c0_i32 : i32, i32
  }
  func.func @transform_1(%arg0: i32) -> (i32, i32) {
    %c0_i32 = arith.constant 0 : i32
    %c0_i32_0 = arith.constant 0 : i32
    %c0_i32_1 = arith.constant 0 : i32
    return %c0_i32, %c0_i32_0 : i32, i32
  }
  func.func @transform_2(%arg0: i32) -> (i32, i32) {
    %c0_i32 = arith.constant 0 : i32
    %c0_i32_0 = arith.constant 0 : i32
    %c0_i32_1 = arith.constant 0 : i32
    return %c0_i32, %c0_i32_0 : i32, i32
  }
  func.func @transform_3(%arg0: i32) -> (i32, i32) {
    %c0_i32 = arith.constant 0 : i32
    %c0_i32_0 = arith.constant 0 : i32
    return %arg0, %c0_i32 : i32, i32
  }
}

</mosaic_0001>

<bundles_post_ra>
// kernel: model_forward.1
= control target key start
LH: loop header
LB: loop body
LE: loop exit
PB: predicated region body
PF: predicated region fallthrough
CT: control target
= control target key end

     0   :  { %8 = vsyncpa [#allocation3], 0  ;;  %s240_s12 = smov [#allocation2]   ;;  %s287_s0 = inlined_call_operand.vmem [shape: f32[8,256], index: 0, kind: input, shape index: {}]   ;;  %s288_s1 = inlined_call_operand.hbm [shape: f32[256,128], index: 1, kind: input, shape index: {}]   ;;  %s289_s2 = inlined_call_operand.vmem [shape: f32[1,128], index: 2, kind: input, shape index: {}]   ;;  %s290_s3 = inlined_call_operand.vmem [shape: f32[8,128], index: 3, kind: output, shape index: {}]  }
   0x1   :  { %s16_s13 = sshll.u32 %s240_s12, 4  ;;  %s216_s16 = scalar_lea.hbm %s288_s1, 4096  ;;  %s17_s13 = int_to_ptr.vmem [resolvable:$true] %s16_s13 }
   0x2   :  { %p217_p0 = scmp.ne.s32.totalorder %s288_s1, %s216_s16  ;;  %p220_p1 = scmp.lt.u32.totalorder %s216_s16, %s288_s1 }
   0x4   :  { %p222_p2 = pnand %p220_p1, %p217_p0 }
   0x6   :  { %225 = shalt.err (!%p222_p2)
}
   0x7   :  { %s226_s21 = scalar_lea.vmem %s17_s13, 4096  ;;  %p231_p4 = scmp.lt.s32.totalorder %s17_s13, %s17_s13 }
   0x8   :  { %p227_p3 = scmp.ne.s32.totalorder %s17_s13, %s226_s21  ;;  %p232_p5 = scmp.lt.s32.totalorder %s226_s21, %s226_s21 }
   0xa   :  { %p233_p6 = por %p232_p5, %p231_p4 }
   0xc   :  { %p234_p7 = pnand %p233_p6, %p227_p3 }
   0xe   :  { %237 = shalt.err (!%p234_p7)
}
   0xf   :  { %s241_s22 = smov 128   ;;  %s242_s23 = smov 8  }
  0x10   :  { %22 = dma.hbm_to_vmem [thread:$0]  %s288_s1, 4096, %s17_s13, [#allocation3], %s241_s22, %s241_s22, %s242_s23  }
  0x11   :  { %238 = dma.done.wait [#allocation3], 4096  }
  0x12   :  { %239 = vsyncadd [#allocation3], 4294963200  ;;  %v46_v0 = vld [vmem:[#allocation2 + $0x80] sm:$0xff]  ;;  %v47_v1 = vld [vmem:[#allocation2 + $0x88] sm:$0xff] }
  0x13   :  { %v30_v2 = vld [vmem:[#allocation2] sm:$0xff]  ;;  %v181_v3 = vpack.c.bf16 %v47_v1, %v46_v0  ;;  %v31_v4 = vld [vmem:[#allocation2 + $0x8] sm:$0xff]  ;;  %v48_v5 = vld [vmem:[#allocation2 + $0x90] sm:$0xff] }
  0x14   :  { %v49_v6 = vld [vmem:[#allocation2 + $0x98] sm:$0xff]  ;;  %v183_v7 = vpack.c.bf16 %v31_v4, %v30_v2  ;;  %v32_v9 = vld [vmem:[#allocation2 + $0x10] sm:$0xff]  ;;  %v50_v11 = vld [vmem:[#allocation2 + $0xa0] sm:$0xff] }
  0x15   :  { %v185_v8 = vpack.c.bf16 %v49_v6, %v48_v5  ;;  %v33_v10 = vld [vmem:[#allocation2 + $0x18] sm:$0xff]  ;;  %182 = vmatprep.subr.bf16.mxu0 %v181_v3  ;;  %v51_v12 = vld [vmem:[#allocation2 + $0xa8] sm:$0xff]  ;;  %v34_v15 = vld [vmem:[#allocation2 + $0x20] sm:$0xff] }
  0x16   :  { %184 = vmatpush3.bf16.msra.mxu0 %v183_v7  ;;  %v187_v13 = vpack.c.bf16 %v33_v10, %v32_v9  ;;  %v189_v14 = vpack.c.bf16 %v51_v12, %v50_v11  ;;  %v35_v16 = vld [vmem:[#allocation2 + $0x28] sm:$0xff]  ;;  %v52_v17 = vld [vmem:[#allocation2 + $0xb0] sm:$0xff]  ;;  %v53_v18 = vld [vmem:[#allocation2 + $0xb8] sm:$0xff] }
  0x17   :  { %186 = vmatprep.subr.bf16.mxu0 %v185_v8  ;;  %v191_v19 = vpack.c.bf16 %v35_v16, %v34_v15  ;;  %v193_v20 = vpack.c.bf16 %v53_v18, %v52_v17  ;;  %v36_v21 = vld [vmem:[#allocation2 + $0x30] sm:$0xff]  ;;  %v37_v22 = vld [vmem:[#allocation2 + $0x38] sm:$0xff]  ;;  %v54_v23 = vld [vmem:[#allocation2 + $0xc0] sm:$0xff] }
  0x18   :  { %v55_v24 = vld [vmem:[#allocation2 + $0xc8] sm:$0xff]  ;;  %v195_v26 = vpack.c.bf16 %v37_v22, %v36_v21  ;;  %v38_v28 = vld [vmem:[#allocation2 + $0x40] sm:$0xff]  ;;  %v56_v30 = vld [vmem:[#allocation2 + $0xd0] sm:$0xff] }
  0x19   :  { %v29_v25 = vld [vmem:[%s287_s0 + $0x8] sm:$0xff]  ;;  %v197_v27 = vpack.c.bf16 %v55_v24, %v54_v23  ;;  %v57_v31 = vld [vmem:[#allocation2 + $0xd8] sm:$0xff]  ;;  %v40_v34 = vld [vmem:[#allocation2 + $0x50] sm:$0xff] }
  0x1a   :  { %188 = vmatpush3.bf16.msra.mxu0 %v187_v13  ;;  %133 = vmatprep.mubr.f32.mxu0 %v29_v25  ;;  %v39_v29 = vld [vmem:[#allocation2 + $0x48] sm:$0xff]  ;;  %v201_v33 = vpack.c.bf16 %v57_v31, %v56_v30  ;;  %v41_v35 = vld [vmem:[#allocation2 + $0x58] sm:$0xff]  ;;  %v58_v36 = vld [vmem:[#allocation2 + $0xe0] sm:$0xff] }
  0x1b   :  { %190 = vmatprep.subr.bf16.mxu0 %v189_v14  ;;  %v199_v32 = vpack.c.bf16 %v39_v29, %v38_v28  ;;  %v59_v37 = vld [vmem:[#allocation2 + $0xe8] sm:$0xff]  ;;  %v203_v38 = vpack.c.bf16 %v41_v35, %v40_v34  ;;  %v42_v40 = vld [vmem:[#allocation2 + $0x60] sm:$0xff]  ;;  %v60_v42 = vld [vmem:[#allocation2 + $0xf0] sm:$0xff] }
  0x1c   :  { %v205_v39 = vpack.c.bf16 %v59_v37, %v58_v36  ;;  %v43_v41 = vld [vmem:[#allocation2 + $0x68] sm:$0xff]  ;;  %v61_v43 = vld [vmem:[#allocation2 + $0xf8] sm:$0xff]  ;;  %v44_v46 = vld [vmem:[#allocation2 + $0x70] sm:$0xff] }
  0x1d   :  { %v207_v44 = vpack.c.bf16 %v43_v41, %v42_v40  ;;  %v209_v45 = vpack.c.bf16 %v61_v43, %v60_v42  ;;  %v45_v47 = vld [vmem:[#allocation2 + $0x78] sm:$0xff]  ;;  %v28_v49 = vld [vmem:[%s287_s0] sm:$0xff] }
  0x1e   :  { %192 = vmatpush3.bf16.msra.mxu0 %v191_v19  ;;  %v211_v48 = vpack.c.bf16 %v45_v47, %v44_v46  ;;  %v145_v51 = vld [vmem:[%s289_s2] ss:$0 sm:$0xff] }
  0x1f   :  { %194 = vmatprep.subr.bf16.mxu0 %v193_v20 }
  0x22   :  { %196 = vmatpush3.bf16.msra.mxu0 %v195_v26 }
  0x23   :  { %198 = vmatprep.subr.bf16.mxu0 %v197_v27 }
  0x26   :  { %200 = vmatpush3.bf16.msra.mxu0 %v199_v32 }
  0x27   :  { %202 = vmatprep.subr.bf16.mxu0 %v201_v33 }
  0x2a   :  { %204 = vmatpush3.bf16.msra.mxu0 %v203_v38 }
  0x2b   :  { %206 = vmatprep.subr.bf16.mxu0 %v205_v39 }
  0x2e   :  { %208 = vmatpush3.bf16.msra.mxu0 %v207_v44 }
  0x2f   :  { %210 = vmatprep.subr.bf16.mxu0 %v209_v45 }
  0x32   :  { %212 = vmatpush3.bf16.msra.mxu0 %v211_v48 }
  0x35   :  { %134 = vmatmul.mubr.f32.vlgmr.msra.gmra.mrb[0].mxu0 %v28_v49 }
 0x108   :  { %v178_v50 = vpop.f32.mrb[0].mxu0 }
 0x109   :  { %v179_v52 = vpop.f32.mrb[1].mxu0 }
 0x10a   :  { %v180_v53 = vadd.f32 %v179_v52, %v178_v50 }
 0x10c   :  { %v136_v54 = vadd.f32 %v180_v53, %v145_v51 }
 0x10e   :  { %139 = vst [vmem:[%s290_s3] sm:$0xff] %v136_v54 }
 0x10f   :  { %144 = vsyncpa [#allocation3], 1 }

</bundles_post_ra>
